<compile_context>
chip_gen: v7x
topology: tpu7x:2x2x1
jax: 0.10.0
libtpu: 0.0.40
codegen_flags: <defaults>
</compile_context>

<pallas_src>
import functools

import jax
import jax.numpy as jnp
from jax import lax
from jax.experimental import pallas as pl
from jax.experimental.pallas import tpu as pltpu


def _mlp_fused_kernel(x_ref,       # (B_pad, D_in)        f32
                      w_in_ref,    # (D_in, H)            bf16
                      b_in_ref,    # (1, H)               f32
                      w_h_ref,     # (num_hidden, H, H)   bf16
                      b_h_ref,     # (num_hidden, 1, H)   f32
                      w_out_ref,   # (H, C_pad)           bf16
                      b_out_ref,   # (1, C_pad)           f32
                      o_ref,       # (B_pad, C_pad)       f32
                      *, num_hidden):
    # Input layer + ReLU.
    act = jnp.maximum(
        jnp.dot(x_ref[...].astype(jnp.bfloat16), w_in_ref[...],
                preferred_element_type=jnp.float32) + b_in_ref[...], 0.0)

    # Residual hidden layers: act = relu(act @ W_l + b_l) + act
    def body(l, act):
        h = jnp.dot(act.astype(jnp.bfloat16), w_h_ref[l],
                    preferred_element_type=jnp.float32)
        return jnp.maximum(h + b_h_ref[l], 0.0) + act

    act = lax.fori_loop(0, num_hidden, body, act, unroll=num_hidden <= 8)

    # Output layer (logits, no activation).
    o_ref[...] = (jnp.dot(act.astype(jnp.bfloat16), w_out_ref[...],
                          preferred_element_type=jnp.float32) + b_out_ref[...])


def _mlp_streamed_kernel(x_ref,      # (B_pad, D_in)    f32   (grid-invariant)
                         w_in_ref,   # (D_in, H)        bf16  (grid-invariant)
                         b_in_ref,   # (1, H)           f32
                         w_h_ref,    # (L, H, H)        bf16  (per-step block)
                         b_h_ref,    # (L, 1, H)        f32   (per-step block)
                         w_out_ref,  # (H, C_pad)       bf16  (grid-invariant)
                         b_out_ref,  # (1, C_pad)       f32
                         o_ref,      # (B_pad, C_pad)   f32
                         act_ref,    # (B_pad, H)       f32 scratch (persists)
                         *, layers_per_step):
    i = pl.program_id(0)

    # Input layer + ReLU, first grid step only.  NOTE: correctness relies on
    # the layer axis being sequential ("arbitrary") and on the constant output
    # index_map -- do not change either without revisiting this.
    @pl.when(i == 0)
    def _():
        h0 = jnp.dot(x_ref[...].astype(jnp.bfloat16), w_in_ref[...],
                     preferred_element_type=jnp.float32)
        act_ref[...] = jnp.maximum(h0 + b_in_ref[...], 0.0)

    # This step's block of residual hidden layers (statically unrolled).
    act = act_ref[...]
    for l in range(layers_per_step):
        h = jnp.dot(act.astype(jnp.bfloat16), w_h_ref[l],
                    preferred_element_type=jnp.float32)
        act = jnp.maximum(h + b_h_ref[l], 0.0) + act
    act_ref[...] = act

    # Output layer (logits), last grid step only.
    @pl.when(i == pl.num_programs(0) - 1)
    def _():
        o_ref[...] = (jnp.dot(act_ref[...].astype(jnp.bfloat16), w_out_ref[...],
                              preferred_element_type=jnp.float32)
                      + b_out_ref[...])


def _round_up(v, m):
    return ((v + m - 1) // m) * m


def mlp_classifier_deep_residual(x, params, *, num_layers,
                                 force_streaming=False, layers_per_step=None):
    """x: (b, 3, H, W) float32. Returns (b, num_classes) float32 logits."""
    assert num_layers >= 3, "Need at least 3 layers for residuals"
    b = x.shape[0]
    x_flat = x.reshape(b, -1).astype(jnp.float32)   # matches torch x.view(b, -1)
    w_in, b_in, w_h, b_h, w_out, b_out = params

    num_hidden = num_layers - 2
    num_classes = w_out.shape[1]
    d_in = x_flat.shape[1]
    hidden = w_in.shape[1]

    # Pad batch to a bf16 sublane-tile multiple (16) and classes to a lane
    # multiple (128): no MXU-input relayout, lane-dense output store.
    b_pad = _round_up(max(b, 16), 16)
    c_pad = _round_up(max(num_classes, 128), 128)
    if b_pad != b:
        x_flat = jnp.pad(x_flat, ((0, b_pad - b), (0, 0)))
    w_out_p = jnp.pad(w_out, ((0, 0), (0, c_pad - num_classes)))
    b_out_p = jnp.pad(b_out, ((0, 0), (0, c_pad - num_classes)))

    # bf16 weights halve the HBM->VMEM weight DMA; biases stay f32.
    w_in_bf = w_in.astype(jnp.bfloat16)
    w_h_bf = w_h.astype(jnp.bfloat16)
    w_out_bf = w_out_p.astype(jnp.bfloat16)

    invariant_bytes = (x_flat.size * 4 + w_in_bf.size * 2 + b_in.size * 4
                       + w_out_bf.size * 2 + b_out_p.size * 4
                       + b_pad * c_pad * 4)
    hidden_stack_bytes = w_h_bf.size * 2 + b_h.size * 4
    act_bytes = b_pad * hidden * 4

    flops = 2 * b_pad * (d_in * hidden + num_hidden * hidden * hidden
                         + hidden * c_pad)
    cost = pl.CostEstimate(flops=flops, transcendentals=0,
                           bytes_accessed=invariant_bytes + hidden_stack_bytes)

    # ---- Fused fast path: single grid step, everything resident. -----------
    # Budget conservatively assumes double-buffered blocks.
    fused_vmem_est = 2 * (invariant_bytes + hidden_stack_bytes) + act_bytes
    use_fused = (not force_streaming) and fused_vmem_est <= 24 * 1024 * 1024

    if use_fused:
        vmem_limit = min(64 * 1024 * 1024,
                         max(4 * 1024 * 1024, int(fused_vmem_est * 1.5)))
        grid_spec = pltpu.PrefetchScalarGridSpec(
            num_scalar_prefetch=0,
            grid=(1,),
            in_specs=[
                pl.BlockSpec((b_pad, d_in), lambda i: (0, 0)),                 # x
                pl.BlockSpec((d_in, hidden), lambda i: (0, 0)),                # w_in
                pl.BlockSpec((1, hidden), lambda i: (0, 0)),                   # b_in
                pl.BlockSpec((num_hidden, hidden, hidden), lambda i: (0, 0, 0)),  # w_h (all layers)
                pl.BlockSpec((num_hidden, 1, hidden), lambda i: (0, 0, 0)),       # b_h (all layers)
                pl.BlockSpec((hidden, c_pad), lambda i: (0, 0)),               # w_out
                pl.BlockSpec((1, c_pad), lambda i: (0, 0)),                    # b_out
            ],
            out_specs=pl.BlockSpec((b_pad, c_pad), lambda i: (0, 0)),
            scratch_shapes=[],
        )
        out = pl.pallas_call(
            functools.partial(_mlp_fused_kernel, num_hidden=num_hidden),
            out_shape=jax.ShapeDtypeStruct((b_pad, c_pad), jnp.float32),
            grid_spec=grid_spec,
            compiler_params=pltpu.CompilerParams(
                dimension_semantics=("arbitrary",),
                vmem_limit_bytes=vmem_limit),
            cost_estimate=cost,
        )(x_flat, w_in_bf, b_in, w_h_bf, b_h, w_out_bf, b_out_p)
        return out[:b, :num_classes]

    # ---- Streaming path: L hidden layers per grid step. --------------------
    if layers_per_step is None:
        per_layer_bytes = hidden * hidden * 2 + hidden * 4
        layers_per_step = max(1, min(num_hidden,
                                     (2 * 1024 * 1024) // per_layer_bytes))
    n_steps = pl.cdiv(num_hidden, layers_per_step)
    nh_pad = n_steps * layers_per_step
    b_h_p = b_h
    if nh_pad != num_hidden:
        # Zero layers are exact identities through relu + residual.
        w_h_bf = jnp.pad(w_h_bf, ((0, nh_pad - num_hidden), (0, 0), (0, 0)))
        b_h_p = jnp.pad(b_h, ((0, nh_pad - num_hidden), (0, 0), (0, 0)))

    step_bytes = layers_per_step * (hidden * hidden * 2 + hidden * 4)
    stream_vmem_est = 2 * invariant_bytes + 2 * step_bytes + act_bytes
    vmem_limit = min(64 * 1024 * 1024,
                     max(4 * 1024 * 1024, int(stream_vmem_est * 1.5)))

    lps = layers_per_step
    grid_spec = pltpu.PrefetchScalarGridSpec(
        num_scalar_prefetch=0,
        grid=(n_steps,),
        in_specs=[
            pl.BlockSpec((b_pad, d_in), lambda i: (0, 0)),          # x (resident)
            pl.BlockSpec((d_in, hidden), lambda i: (0, 0)),         # w_in (resident)
            pl.BlockSpec((1, hidden), lambda i: (0, 0)),            # b_in
            pl.BlockSpec((lps, hidden, hidden), lambda i: (i, 0, 0)),  # w_h block
            pl.BlockSpec((lps, 1, hidden), lambda i: (i, 0, 0)),       # b_h block
            pl.BlockSpec((hidden, c_pad), lambda i: (0, 0)),        # w_out (resident)
            pl.BlockSpec((1, c_pad), lambda i: (0, 0)),             # b_out
        ],
        out_specs=pl.BlockSpec((b_pad, c_pad), lambda i: (0, 0)),
        scratch_shapes=[pltpu.VMEM((b_pad, hidden), jnp.float32)],
    )
    out = pl.pallas_call(
        functools.partial(_mlp_streamed_kernel, layers_per_step=lps),
        out_shape=jax.ShapeDtypeStruct((b_pad, c_pad), jnp.float32),
        grid_spec=grid_spec,
        compiler_params=pltpu.CompilerParams(
            dimension_semantics=("arbitrary",),        # layer axis carries state
            vmem_limit_bytes=vmem_limit),
        cost_estimate=cost,
    )(x_flat, w_in_bf, b_in, w_h_bf, b_h_p, w_out_bf, b_out_p)
    return out[:b, :num_classes]


def init_params(key, *, h, w, hidden_dim, num_classes, num_layers):
    """Deterministic init mimicking torch.nn.Linear (uniform +- 1/sqrt(fan_in))."""
    d_in = 3 * h * w
    num_hidden = num_layers - 2
    keys = jax.random.split(key, 6)

    def unif(k, shape, fan_in):
        bound = 1.0 / jnp.sqrt(fan_in)
        return jax.random.uniform(k, shape, jnp.float32, -bound, bound)

    w_in = unif(keys[0], (d_in, hidden_dim), d_in)
    b_in = unif(keys[1], (1, hidden_dim), d_in)
    w_h = unif(keys[2], (num_hidden, hidden_dim, hidden_dim), hidden_dim)
    b_h = unif(keys[3], (num_hidden, 1, hidden_dim), hidden_dim)
    w_out = unif(keys[4], (hidden_dim, num_classes), hidden_dim)
    b_out = unif(keys[5], (1, num_classes), hidden_dim)
    return (w_in, b_in, w_h, b_h, w_out, b_out)


def _reference_forward(x, params, num_layers):
    """Plain-JAX reference with the same bf16-weight / f32-accumulate math."""
    w_in, b_in, w_h, b_h, w_out, b_out = params
    bf = jnp.bfloat16
    b = x.shape[0]
    x_flat = x.reshape(b, -1)
    out = jnp.maximum(
        jnp.dot(x_flat.astype(bf), w_in.astype(bf),
                preferred_element_type=jnp.float32) + b_in, 0.0)
    for i in range(num_layers - 2):
        h = jnp.dot(out.astype(bf), w_h[i].astype(bf),
                    preferred_element_type=jnp.float32)
        out = jnp.maximum(h + b_h[i], 0.0) + out
    return jnp.dot(out.astype(bf), w_out.astype(bf),
                   preferred_element_type=jnp.float32) + b_out


if __name__ == "__main__":
    # Small shapes consistent with the module: b=2, 3-channel 16x16 image,
    # hidden_dim=128, num_classes=6, num_layers=5 (-> 3 residual layers).
    B, H_IMG, W_IMG = 2, 16, 16
    HIDDEN, NUM_CLASSES, NUM_LAYERS = 128, 6, 5

    key = jax.random.PRNGKey(0)
    k_x, k_p = jax.random.split(key)
    x = jax.random.normal(k_x, (B, 3, H_IMG, W_IMG), jnp.float32)
    params = init_params(k_p, h=H_IMG, w=W_IMG, hidden_dim=HIDDEN,
                         num_classes=NUM_CLASSES, num_layers=NUM_LAYERS)

    ref = _reference_forward(x, params, NUM_LAYERS)

    # Fused (single grid step) path -- what this size actually uses.
    logits = mlp_classifier_deep_residual(x, params, num_layers=NUM_LAYERS)
    logits = jax.block_until_ready(logits)
    assert logits.shape == (B, NUM_CLASSES)
    diff = jnp.max(jnp.abs(logits - ref))
    assert jnp.allclose(logits, ref, atol=2e-2, rtol=2e-2), f"fused max|diff|={diff}"

    # Streaming path (used for deep / large-hidden nets); force it with 2
    # layers per grid step so the multi-step + identity-padding code is
    # exercised too.
    logits_s = mlp_classifier_deep_residual(x, params, num_layers=NUM_LAYERS,
                                            force_streaming=True,
                                            layers_per_step=2)
    logits_s = jax.block_until_ready(logits_s)
    diff_s = jnp.max(jnp.abs(logits_s - ref))
    assert jnp.allclose(logits_s, ref, atol=2e-2, rtol=2e-2), f"streamed max|diff|={diff_s}"

    print("KERNEL_OK")
</pallas_src>

<mosaic_0001>
module attributes {stable_mosaic.version = 11 : i64} {
  func.func @_mlp_fused_kernel(%arg0: i32, %arg1: memref<16x768xf32, #tpu.memory_space<vmem>>, %arg2: memref<768x128xbf16, #tpu.memory_space<vmem>>, %arg3: memref<1x128xf32, #tpu.memory_space<vmem>>, %arg4: memref<3x128x128xbf16, #tpu.memory_space<vmem>>, %arg5: memref<3x1x128xf32, #tpu.memory_space<vmem>>, %arg6: memref<128x128xbf16, #tpu.memory_space<vmem>>, %arg7: memref<1x128xf32, #tpu.memory_space<vmem>>, %arg8: memref<16x128xf32, #tpu.memory_space<vmem>>) attributes {dimension_semantics = [#tpu.dimension_semantics<arbitrary>], iteration_bounds = array<i64: 1>, scalar_prefetch = 0 : i64, scratch_operands = 0 : i64, tpu.core_type = #tpu.core_type<tc>, window_params = [{pipeline_mode = #tpu.pipeline_mode<synchronous>, transform_indices = @transform_0, window_bounds = array<i64: 16, 768>}, {pipeline_mode = #tpu.pipeline_mode<synchronous>, transform_indices = @transform_1, window_bounds = array<i64: 768, 128>}, {pipeline_mode = #tpu.pipeline_mode<synchronous>, transform_indices = @transform_2, window_bounds = array<i64: 1, 128>}, {pipeline_mode = #tpu.pipeline_mode<synchronous>, transform_indices = @transform_3, window_bounds = array<i64: 3, 128, 128>}, {pipeline_mode = #tpu.pipeline_mode<synchronous>, transform_indices = @transform_4, window_bounds = array<i64: 3, 1, 128>}, {pipeline_mode = #tpu.pipeline_mode<synchronous>, transform_indices = @transform_5, window_bounds = array<i64: 128, 128>}, {pipeline_mode = #tpu.pipeline_mode<synchronous>, transform_indices = @transform_6, window_bounds = array<i64: 1, 128>}, {pipeline_mode = #tpu.pipeline_mode<synchronous>, transform_indices = @transform_7, window_bounds = array<i64: 16, 128>}]} {
    %c0 = arith.constant 0 : index
    %c0_0 = arith.constant 0 : index
    %0 = vector.load %arg1[%c0, %c0_0] : memref<16x768xf32, #tpu.memory_space<vmem>>, vector<16x768xf32>
    %1 = arith.truncf %0 : vector<16x768xf32> to vector<16x768xbf16>
    %c0_1 = arith.constant 0 : index
    %c0_2 = arith.constant 0 : index
    %2 = vector.load %arg2[%c0_1, %c0_2] : memref<768x128xbf16, #tpu.memory_space<vmem>>, vector<768x128xbf16>
    %cst = arith.constant dense<0.000000e+00> : vector<16x128xf32>
    %3 = tpu.matmul %1, %2, %cst {dimension_numbers = #tpu.dot_dimension_numbers<[1], [0], [0], [1], [0, 0, 1, 1], [], []>} : vector<16x768xbf16>, vector<768x128xbf16>, vector<16x128xf32> -> vector<16x128xf32>
    %c0_3 = arith.constant 0 : index
    %c0_4 = arith.constant 0 : index
    %4 = vector.load %arg3[%c0_3, %c0_4] : memref<1x128xf32, #tpu.memory_space<vmem>>, vector<1x128xf32>
    %5 = vector.broadcast %4 : vector<1x128xf32> to vector<16x128xf32>
    %6 = arith.addf %3, %5 : vector<16x128xf32>
    %cst_5 = arith.constant 0.000000e+00 : f32
    %7 = vector.broadcast %cst_5 : f32 to vector<16x128xf32>
    %8 = arith.maximumf %6, %7 : vector<16x128xf32>
    %c0_i32 = arith.constant 0 : i32
    %9 = arith.truncf %8 : vector<16x128xf32> to vector<16x128xbf16>
    %10 = arith.index_cast %c0_i32 : i32 to index
    %c0_6 = arith.constant 0 : index
    %c0_7 = arith.constant 0 : index
    %11 = vector.load %arg4[%10, %c0_6, %c0_7] : memref<3x128x128xbf16, #tpu.memory_space<vmem>>, vector<1x128x128xbf16>
    %12 = vector.shape_cast %11 : vector<1x128x128xbf16> to vector<128x128xbf16>
    %cst_8 = arith.constant dense<0.000000e+00> : vector<16x128xf32>
    %13 = tpu.matmul %9, %12, %cst_8 {dimension_numbers = #tpu.dot_dimension_numbers<[1], [0], [0], [1], [0, 0, 1, 1], [], []>} : vector<16x128xbf16>, vector<128x128xbf16>, vector<16x128xf32> -> vector<16x128xf32>
    %14 = arith.index_cast %c0_i32 : i32 to index
    %c0_9 = arith.constant 0 : index
    %c0_10 = arith.constant 0 : index
    %15 = vector.load %arg5[%14, %c0_9, %c0_10] : memref<3x1x128xf32, #tpu.memory_space<vmem>>, vector<1x1x128xf32>
    %16 = vector.shape_cast %15 : vector<1x1x128xf32> to vector<1x128xf32>
    %17 = vector.broadcast %16 : vector<1x128xf32> to vector<16x128xf32>
    %18 = arith.addf %13, %17 : vector<16x128xf32>
    %cst_11 = arith.constant 0.000000e+00 : f32
    %19 = vector.broadcast %cst_11 : f32 to vector<16x128xf32>
    %20 = arith.maximumf %18, %19 : vector<16x128xf32>
    %21 = arith.addf %20, %8 : vector<16x128xf32>
    %c1_i32 = arith.constant 1 : i32
    %22 = arith.truncf %21 : vector<16x128xf32> to vector<16x128xbf16>
    %23 = arith.index_cast %c1_i32 : i32 to index
    %c0_12 = arith.constant 0 : index
    %c0_13 = arith.constant 0 : index
    %24 = vector.load %arg4[%23, %c0_12, %c0_13] : memref<3x128x128xbf16, #tpu.memory_space<vmem>>, vector<1x128x128xbf16>
    %25 = vector.shape_cast %24 : vector<1x128x128xbf16> to vector<128x128xbf16>
    %cst_14 = arith.constant dense<0.000000e+00> : vector<16x128xf32>
    %26 = tpu.matmul %22, %25, %cst_14 {dimension_numbers = #tpu.dot_dimension_numbers<[1], [0], [0], [1], [0, 0, 1, 1], [], []>} : vector<16x128xbf16>, vector<128x128xbf16>, vector<16x128xf32> -> vector<16x128xf32>
    %27 = arith.index_cast %c1_i32 : i32 to index
    %c0_15 = arith.constant 0 : index
    %c0_16 = arith.constant 0 : index
    %28 = vector.load %arg5[%27, %c0_15, %c0_16] : memref<3x1x128xf32, #tpu.memory_space<vmem>>, vector<1x1x128xf32>
    %29 = vector.shape_cast %28 : vector<1x1x128xf32> to vector<1x128xf32>
    %30 = vector.broadcast %29 : vector<1x128xf32> to vector<16x128xf32>
    %31 = arith.addf %26, %30 : vector<16x128xf32>
    %cst_17 = arith.constant 0.000000e+00 : f32
    %32 = vector.broadcast %cst_17 : f32 to vector<16x128xf32>
    %33 = arith.maximumf %31, %32 : vector<16x128xf32>
    %34 = arith.addf %33, %21 : vector<16x128xf32>
    %c2_i32 = arith.constant 2 : i32
    %35 = arith.truncf %34 : vector<16x128xf32> to vector<16x128xbf16>
    %36 = arith.index_cast %c2_i32 : i32 to index
    %c0_18 = arith.constant 0 : index
    %c0_19 = arith.constant 0 : index
    %37 = vector.load %arg4[%36, %c0_18, %c0_19] : memref<3x128x128xbf16, #tpu.memory_space<vmem>>, vector<1x128x128xbf16>
    %38 = vector.shape_cast %37 : vector<1x128x128xbf16> to vector<128x128xbf16>
    %cst_20 = arith.constant dense<0.000000e+00> : vector<16x128xf32>
    %39 = tpu.matmul %35, %38, %cst_20 {dimension_numbers = #tpu.dot_dimension_numbers<[1], [0], [0], [1], [0, 0, 1, 1], [], []>} : vector<16x128xbf16>, vector<128x128xbf16>, vector<16x128xf32> -> vector<16x128xf32>
    %40 = arith.index_cast %c2_i32 : i32 to index
    %c0_21 = arith.constant 0 : index
    %c0_22 = arith.constant 0 : index
    %41 = vector.load %arg5[%40, %c0_21, %c0_22] : memref<3x1x128xf32, #tpu.memory_space<vmem>>, vector<1x1x128xf32>
    %42 = vector.shape_cast %41 : vector<1x1x128xf32> to vector<1x128xf32>
    %43 = vector.broadcast %42 : vector<1x128xf32> to vector<16x128xf32>
    %44 = arith.addf %39, %43 : vector<16x128xf32>
    %cst_23 = arith.constant 0.000000e+00 : f32
    %45 = vector.broadcast %cst_23 : f32 to vector<16x128xf32>
    %46 = arith.maximumf %44, %45 : vector<16x128xf32>
    %47 = arith.addf %46, %34 : vector<16x128xf32>
    %c3_i32 = arith.constant 3 : i32
    %48 = arith.truncf %47 : vector<16x128xf32> to vector<16x128xbf16>
    %c0_24 = arith.constant 0 : index
    %c0_25 = arith.constant 0 : index
    %49 = vector.load %arg6[%c0_24, %c0_25] : memref<128x128xbf16, #tpu.memory_space<vmem>>, vector<128x128xbf16>
    %cst_26 = arith.constant dense<0.000000e+00> : vector<16x128xf32>
    %50 = tpu.matmul %48, %49, %cst_26 {dimension_numbers = #tpu.dot_dimension_numbers<[1], [0], [0], [1], [0, 0, 1, 1], [], []>} : vector<16x128xbf16>, vector<128x128xbf16>, vector<16x128xf32> -> vector<16x128xf32>
    %c0_27 = arith.constant 0 : index
    %c0_28 = arith.constant 0 : index
    %51 = vector.load %arg7[%c0_27, %c0_28] : memref<1x128xf32, #tpu.memory_space<vmem>>, vector<1x128xf32>
    %52 = vector.broadcast %51 : vector<1x128xf32> to vector<16x128xf32>
    %53 = arith.addf %50, %52 : vector<16x128xf32>
    %c0_29 = arith.constant 0 : index
    %c0_30 = arith.constant 0 : index
    %54 = vector.load %arg8[%c0_29, %c0_30] : memref<16x128xf32, #tpu.memory_space<vmem>>, vector<16x128xf32>
    tpu.vector_store %arg8[%c0_29, %c0_30], %53 {strides = array<i32>} : memref<16x128xf32, #tpu.memory_space<vmem>>, vector<16x128xf32>,
    return
  }
  func.func @transform_0(%arg0: i32) -> (i32, i32) {
    %c0_i32 = arith.constant 0 : i32
    %c0_i32_0 = arith.constant 0 : i32
    %c0_i32_1 = arith.constant 0 : i32
    return %c0_i32, %c0_i32_0 : i32, i32
  }
  func.func @transform_1(%arg0: i32) -> (i32, i32) {
    %c0_i32 = arith.constant 0 : i32
    %c0_i32_0 = arith.constant 0 : i32
    %c0_i32_1 = arith.constant 0 : i32
    return %c0_i32, %c0_i32_0 : i32, i32
  }
  func.func @transform_2(%arg0: i32) -> (i32, i32) {
    %c0_i32 = arith.constant 0 : i32
    %c0_i32_0 = arith.constant 0 : i32
    %c0_i32_1 = arith.constant 0 : i32
    return %c0_i32, %c0_i32_0 : i32, i32
  }
  func.func @transform_3(%arg0: i32) -> (i32, i32, i32) {
    %c0_i32 = arith.constant 0 : i32
    %c0_i32_0 = arith.constant 0 : i32
    %c0_i32_1 = arith.constant 0 : i32
    %c0_i32_2 = arith.constant 0 : i32
    return %c0_i32, %c0_i32_0, %c0_i32_1 : i32, i32, i32
  }
  func.func @transform_4(%arg0: i32) -> (i32, i32, i32) {
    %c0_i32 = arith.constant 0 : i32
    %c0_i32_0 = arith.constant 0 : i32
    %c0_i32_1 = arith.constant 0 : i32
    %c0_i32_2 = arith.constant 0 : i32
    return %c0_i32, %c0_i32_0, %c0_i32_1 : i32, i32, i32
  }
  func.func @transform_5(%arg0: i32) -> (i32, i32) {
    %c0_i32 = arith.constant 0 : i32
    %c0_i32_0 = arith.constant 0 : i32
    %c0_i32_1 = arith.constant 0 : i32
    return %c0_i32, %c0_i32_0 : i32, i32
  }
  func.func @transform_6(%arg0: i32) -> (i32, i32) {
    %c0_i32 = arith.constant 0 : i32
    %c0_i32_0 = arith.constant 0 : i32
    %c0_i32_1 = arith.constant 0 : i32
    return %c0_i32, %c0_i32_0 : i32, i32
  }
  func.func @transform_7(%arg0: i32) -> (i32, i32) {
    %c0_i32 = arith.constant 0 : i32
    %c0_i32_0 = arith.constant 0 : i32
    %c0_i32_1 = arith.constant 0 : i32
    return %c0_i32, %c0_i32_0 : i32, i32
  }
}

</mosaic_0001>

<bundles_post_ra>
// kernel: tpu_custom_call.1
= control target key start
LH: loop header
LB: loop body
LE: loop exit
PB: predicated region body
PF: predicated region fallthrough
CT: control target
= control target key end

     0   :  { %12 = vsyncpa [#allocation3], 0  ;;  %s1770_s0 = inlined_call_operand.hbm [shape: f32[16,768], index: 0, kind: input, shape index: {}]   ;;  %s1771_s1 = inlined_call_operand.hbm [shape: bf16[768,128], index: 1, kind: input, shape index: {}]   ;;  %s1772_s2 = inlined_call_operand.vmem [shape: f32[1,128], index: 2, kind: input, shape index: {}]   ;;  %s1773_s3 = inlined_call_operand.hbm [shape: bf16[3,128,128], index: 3, kind: input, shape index: {}]   ;;  %s1774_s4 = inlined_call_operand.vmem [shape: f32[3,1,128], index: 4, kind: input, shape index: {}]   ;;  %s1775_s5 = inlined_call_operand.hbm [shape: bf16[128,128], index: 5, kind: input, shape index: {}]   ;;  %s1776_s6 = inlined_call_operand.vmem [shape: f32[1,128], index: 6, kind: input, shape index: {}]   ;;  %s1777_s7 = inlined_call_operand.hbm [shape: f32[16,128], index: 7, kind: output, shape index: {}]  }
   0x1   :  { %13 = vsyncpa [#allocation6], 0 }
   0x2   :  { %14 = vsyncpa [#allocation9], 0 }
   0x3   :  { %15 = vsyncpa [#allocation4], 0  ;;  %s1586_s24 = smov [#allocation5]   ;;  %s1468_s28 = scalar_lea.hbm %s1771_s1, 6144 }
   0x4   :  { %s33_s25 = sshll.u32 %s1586_s24, 4  ;;  %p1469_p0 = scmp.ne.s32.totalorder %s1771_s1, %s1468_s28  ;;  %s34_s25 = int_to_ptr.vmem [resolvable:$true] %s33_s25 }
   0x5   :  { %p1472_p1 = scmp.lt.u32.totalorder %s1468_s28, %s1771_s1 }
   0x7   :  { %p1474_p2 = pnand %p1472_p1, %p1469_p0 }
   0x9   :  { %1477 = shalt.err (!%p1474_p2)
}
   0xa   :  { %s1478_s10 = scalar_lea.vmem %s34_s25, 6144  ;;  %p1483_p4 = scmp.lt.s32.totalorder %s34_s25, %s34_s25 }
   0xb   :  { %p1479_p3 = scmp.ne.s32.totalorder %s34_s25, %s1478_s10  ;;  %p1484_p5 = scmp.lt.s32.totalorder %s1478_s10, %s1478_s10 }
   0xd   :  { %p1485_p6 = por %p1484_p5, %p1483_p4 }
   0xf   :  { %p1486_p7 = pnand %p1485_p6, %p1479_p3 }
  0x11   :  { %1489 = shalt.err (!%p1486_p7)
}
  0x12   :  { %s1587_s11 = smov 64   ;;  %s1588_s12 = smov 4  }
  0x13   :  { %39 = dma.hbm_to_vmem [thread:$0]  %s1771_s1, 6144, %s34_s25, [#allocation6], %s1587_s11, %s1587_s11, %s1588_s12  }
  0x14   :  { %s1589_s15 = smov [#allocation2]   ;;  %s1490_s19 = scalar_lea.hbm %s1770_s0, 1536 }
  0x15   :  { %s21_s16 = sshll.u32 %s1589_s15, 4  ;;  %p1491_p8 = scmp.ne.s32.totalorder %s1770_s0, %s1490_s19  ;;  %s22_s16 = int_to_ptr.vmem [resolvable:$true] %s21_s16 }
  0x16   :  { %p1494_p9 = scmp.lt.u32.totalorder %s1490_s19, %s1770_s0 }
  0x18   :  { %p1496_p10 = pnand %p1494_p9, %p1491_p8 }
  0x1a   :  { %1499 = shalt.err (!%p1496_p10)
}
  0x1b   :  { %s1500_s24 = scalar_lea.vmem %s22_s16, 1536  ;;  %p1505_p12 = scmp.lt.s32.totalorder %s22_s16, %s22_s16 }
  0x1c   :  { %p1501_p11 = scmp.ne.s32.totalorder %s22_s16, %s1500_s24  ;;  %p1506_p13 = scmp.lt.s32.totalorder %s1500_s24, %s1500_s24 }
  0x1e   :  { %p1507_p0 = por %p1506_p13, %p1505_p12 }
  0x20   :  { %p1508_p1 = pnand %p1507_p0, %p1501_p11 }
  0x22   :  { %1511 = shalt.err (!%p1508_p1)
}
  0x23   :  { %s1590_s1 = smov 768   ;;  %s1591_s25 = smov 48  }
  0x24   :  { %27 = dma.hbm_to_vmem [thread:$0]  %s1770_s0, 1536, %s22_s16, [#allocation3], %s1590_s1, %s1590_s1, %s1591_s25  }
  0x25   :  { %s1592_s28 = smov [#allocation7]   ;;  %s1593_s30 = smov [#allocation8]  }
  0x26   :  { %s47_s29 = sshll.u32 %s1592_s28, 4  ;;  %s61_s8 = sshll.u32 %s1593_s30, 4  ;;  %s48_s29 = int_to_ptr.vmem [resolvable:$true] %s47_s29  ;;  %s1666_s8 = int_to_ptr.vmem [resolvable:$true] %s61_s8 }
  0x27   :  { %s1512_s13 = scalar_lea.hbm %s1773_s3, 3072 }
  0x28   :  { %p1513_p2 = scmp.ne.s32.totalorder %s1773_s3, %s1512_s13  ;;  %p1516_p3 = scmp.lt.u32.totalorder %s1512_s13, %s1773_s3 }
  0x2a   :  { %p1518_p4 = pnand %p1516_p3, %p1513_p2 }
  0x2c   :  { %1521 = shalt.err (!%p1518_p4)
}
  0x2d   :  { %s1522_s0 = scalar_lea.vmem %s48_s29, 3072  ;;  %p1527_p6 = scmp.lt.s32.totalorder %s48_s29, %s48_s29 }
  0x2e   :  { %p1523_p5 = scmp.ne.s32.totalorder %s48_s29, %s1522_s0  ;;  %p1528_p7 = scmp.lt.s32.totalorder %s1522_s0, %s1522_s0 }
  0x30   :  { %p1529_p8 = por %p1528_p7, %p1527_p6 }
  0x32   :  { %p1530_p9 = pnand %p1529_p8, %p1523_p5 }
  0x34   :  { %1533 = shalt.err (!%p1530_p9)
}
  0x35   :  { %53 = dma.hbm_to_vmem [thread:$0]  %s1773_s3, 3072, %s48_s29, [#allocation6], %s1587_s11, %s1587_s11, %s1588_s12  }
  0x36   :  { %s1534_s22 = scalar_lea.hbm %s1775_s5, 1024 }
  0x37   :  { %p1535_p10 = scmp.ne.s32.totalorder %s1775_s5, %s1534_s22  ;;  %p1538_p11 = scmp.lt.u32.totalorder %s1534_s22, %s1775_s5 }
  0x39   :  { %p1540_p12 = pnand %p1538_p11, %p1535_p10 }
  0x3b   :  { %1543 = shalt.err (!%p1540_p12)
}
  0x3c   :  { %s1544_s26 = scalar_lea.vmem %s1666_s8, 1024  ;;  %p1549_p0 = scmp.lt.s32.totalorder %s1666_s8, %s1666_s8 }
  0x3d   :  { %p1545_p13 = scmp.ne.s32.totalorder %s1666_s8, %s1544_s26  ;;  %p1550_p1 = scmp.lt.s32.totalorder %s1544_s26, %s1544_s26 }
  0x3f   :  { %p1551_p2 = por %p1550_p1, %p1549_p0 }
  0x41   :  { %p1552_p3 = pnand %p1551_p2, %p1545_p13 }
  0x43   :  { %1555 = shalt.err (!%p1552_p3)
}
  0x44   :  { %67 = dma.hbm_to_vmem [thread:$0]  %s1775_s5, 1024, %s1666_s8, [#allocation9], %s1587_s11, %s1587_s11, %s1588_s12  }
  0x45   :  { %1578 = dma.done.wait [#allocation3], 1536  }
  0x46   :  { %1579 = vsyncadd [#allocation3], 4294965760 }
  0x47   :  { %1580 = dma.done.wait [#allocation6], 9216  }
  0x48   :  { %1581 = vsyncadd [#allocation6], 4294958080 }
  0x49   :  { %1582 = dma.done.wait [#allocation9], 1024  }
  0x4a   :  { %1583 = vsyncadd [#allocation9], 4294966272  ;;  %v1388_v0 = vld [vmem:[#allocation5 + $0x40] sm:$0xff]   ;;  %v1392_v4 = vld [vmem:[#allocation5 + $0x48] sm:$0xff]   ;;  %vm1595_vm0 = vmmov 0   ;;  %s1596_s13 = smov [#allocation10]  }
  0x4b   :  { %v1389_v1 = vld [vmem:[#allocation5] sm:$0xff]   ;;  %1193 = vmatprep.subr.bf16.mxu0 %v1388_v0  ;;  %v1393_v5 = vld [vmem:[#allocation5 + $0x8] sm:$0xff]   ;;  %v1396_v8 = vld [vmem:[#allocation5 + $0x50] sm:$0xff]   ;;  %s1092_s14 = sshll.u32 %s1596_s13, 4  ;;  %s1093_s14 = int_to_ptr.vmem [resolvable:$true] %s1092_s14 }
  0x4c   :  { %v1390_v2 = vld [vmem:[#allocation5 + $0xc0] sm:$0xff]   ;;  %1194 = vmatpush3.bf16.msra.mxu0 %v1389_v1  ;;  %v1394_v6 = vld [vmem:[#allocation5 + $0xc8] sm:$0xff]   ;;  %v1397_v9 = vld [vmem:[#allocation5 + $0x10] sm:$0xff]   ;;  %p1561_p5 = scmp.lt.s32.totalorder %s1093_s14, %s1093_s14 }
  0x4d   :  { %v1391_v3 = vld [vmem:[#allocation5 + $0x80] sm:$0xff]   ;;  %1215 = vmatprep.subr.bf16.mxu1 %v1390_v2  ;;  %1195 = vmatprep.subr.bf16.mxu0 %v1392_v4  ;;  %v1395_v7 = vld [vmem:[#allocation5 + $0x88] sm:$0xff]   ;;  %v1398_v10 = vld [vmem:[#allocation5 + $0xd0] sm:$0xff]  }
  0x4e   :  { %1216 = vmatpush3.bf16.msra.mxu1 %v1391_v3  ;;  %v1399_v11 = vld [vmem:[#allocation5 + $0x90] sm:$0xff]   ;;  %v1400_v12 = vld [vmem:[#allocation5 + $0x58] sm:$0xff]   ;;  %v1404_v16 = vld [vmem:[#allocation5 + $0x60] sm:$0xff]   ;;  %v1594_v3 = vmov 0.0  }
  0x4f   :  { %1217 = vmatprep.subr.bf16.mxu1 %v1394_v6  ;;  %v1401_v13 = vld [vmem:[#allocation5 + $0x18] sm:$0xff]   ;;  %v1405_v17 = vld [vmem:[#allocation5 + $0x20] sm:$0xff]   ;;  %v1408_v20 = vld [vmem:[#allocation5 + $0x68] sm:$0xff]  }
  0x50   :  { %1196 = vmatpush3.bf16.msra.mxu0 %v1393_v5  ;;  %v1402_v14 = vld [vmem:[#allocation5 + $0xd8] sm:$0xff]   ;;  %v1406_v18 = vld [vmem:[#allocation5 + $0xe0] sm:$0xff]   ;;  %v1409_v21 = vld [vmem:[#allocation5 + $0x28] sm:$0xff]  }
  0x51   :  { %1197 = vmatprep.subr.bf16.mxu0 %v1396_v8  ;;  %v1403_v15 = vld [vmem:[#allocation5 + $0x98] sm:$0xff]   ;;  %v1407_v19 = vld [vmem:[#allocation5 + $0xa0] sm:$0xff]   ;;  %v1410_v22 = vld [vmem:[#allocation5 + $0xe8] sm:$0xff]  }
  0x52   :  { %1218 = vmatpush3.bf16.msra.mxu1 %v1395_v7  ;;  %v1411_v23 = vld [vmem:[#allocation5 + $0xa8] sm:$0xff]   ;;  %v1412_v24 = vld [vmem:[#allocation5 + $0x70] sm:$0xff]   ;;  %v1416_v28 = vld [vmem:[#allocation5 + $0x78] sm:$0xff]  }
  0x53   :  { %1219 = vmatprep.subr.bf16.mxu1 %v1398_v10  ;;  %v1413_v25 = vld [vmem:[#allocation5 + $0x30] sm:$0xff]   ;;  %v1417_v29 = vld [vmem:[#allocation5 + $0x38] sm:$0xff]   ;;  %v84_v31 = vld [vmem:[#allocation2 + $0x8] sm:$0xff] }
  0x54   :  { %1198 = vmatpush3.bf16.msra.mxu0 %v1397_v9  ;;  %v1414_v26 = vld [vmem:[#allocation5 + $0xf0] sm:$0xff]   ;;  %v1418_v30 = vld [vmem:[#allocation5 + $0xf8] sm:$0xff]   ;;  %v83_v35 = vld [vmem:[#allocation2] sm:$0xff] }
  0x55   :  { %1199 = vmatprep.subr.bf16.mxu0 %v1400_v12  ;;  %v1415_v27 = vld [vmem:[#allocation5 + $0xb0] sm:$0xff]   ;;  %v90_v32 = vld [vmem:[#allocation2 + $0x38] sm:$0xff]  ;;  %v1420_v38 = vld [vmem:[#allocation5 + $0x140] sm:$0xff]  }
  0x56   :  { %1220 = vmatpush3.bf16.msra.mxu1 %v1399_v11  ;;  %v96_v33 = vpack.c.bf16 %v90_v32, %v84_v31  ;;  %v1419_v34 = vld [vmem:[#allocation5 + $0xb8] sm:$0xff]   ;;  %v89_v36 = vld [vmem:[#allocation2 + $0x30] sm:$0xff]  ;;  %v92_v40 = vld [vmem:[#allocation2 + $0x48] sm:$0xff] }
  0x57   :  { %1221 = vmatprep.subr.bf16.mxu1 %v1402_v14  ;;  %v95_v37 = vpack.c.bf16 %v89_v36, %v83_v35  ;;  %v86_v39 = vld [vmem:[#allocation2 + $0x18] sm:$0xff]  ;;  %v1421_v42 = vld [vmem:[#allocation5 + $0x100] sm:$0xff]   ;;  %v85_v43 = vld [vmem:[#allocation2 + $0x10] sm:$0xff] }
  0x58   :  { %1200 = vmatpush3.bf16.msra.mxu0 %v1401_v13  ;;  %524 = vmatprep.mubr.bf16.mxu0 %v96_v33  ;;  %v98_v41 = vpack.c.bf16 %v92_v40, %v86_v39  ;;  %v91_v44 = vld [vmem:[#allocation2 + $0x40] sm:$0xff]  ;;  %v1422_v46 = vld [vmem:[#allocation5 + $0x148] sm:$0xff]   ;;  %v1424_v48 = vld [vmem:[#allocation5 + $0x150] sm:$0xff]  }
  0x59   :  { %1201 = vmatprep.subr.bf16.mxu0 %v1404_v16  ;;  %v97_v45 = vpack.c.bf16 %v91_v44, %v85_v43  ;;  %v1423_v47 = vld [vmem:[#allocation5 + $0x108] sm:$0xff]   ;;  %v1425_v49 = vld [vmem:[#allocation5 + $0x110] sm:$0xff]   ;;  %v1426_v50 = vld [vmem:[#allocation5 + $0x158] sm:$0xff]  }
  0x5a   :  { %1222 = vmatpush3.bf16.msra.mxu1 %v1403_v15  ;;  %565 = vmatprep.mubr.bf16.mxu1 %v98_v41  ;;  %v1427_v51 = vld [vmem:[#allocation5 + $0x118] sm:$0xff]   ;;  %v1428_v52 = vld [vmem:[#allocation5 + $0x160] sm:$0xff]   ;;  %v1430_v54 = vld [vmem:[#allocation5 + $0x168] sm:$0xff]  }
  0x5b   :  { %1223 = vmatprep.subr.bf16.mxu1 %v1406_v18  ;;  %v1429_v53 = vld [vmem:[#allocation5 + $0x120] sm:$0xff]   ;;  %v88_v55 = vld [vmem:[#allocation2 + $0x28] sm:$0xff]  ;;  %v94_v57 = vld [vmem:[#allocation2 + $0x58] sm:$0xff] }
  0x5c   :  { %1202 = vmatpush3.bf16.msra.mxu0 %v1405_v17  ;;  %v1431_v56 = vld [vmem:[#allocation5 + $0x128] sm:$0xff]   ;;  %v1432_v58 = vld [vmem:[#allocation5 + $0x170] sm:$0xff]   ;;  %v100_v59 = vpack.c.bf16 %v94_v57, %v88_v55  ;;  %v1434_v61 = vld [vmem:[#allocation5 + $0x178] sm:$0xff]  }
  0x5d   :  { %1203 = vmatprep.subr.bf16.mxu0 %v1408_v20  ;;  %v1433_v60 = vld [vmem:[#allocation5 + $0x130] sm:$0xff]   ;;  %v1435_v62 = vld [vmem:[#allocation5 + $0x138] sm:$0xff]   ;;  %v87_v63 = vld [vmem:[#allocation2 + $0x20] sm:$0xff] }
  0x5e   :  { %1224 = vmatpush3.bf16.msra.mxu1 %v1407_v19  ;;  %v93_v0 = vld [vmem:[#allocation2 + $0x50] sm:$0xff]  ;;  %v1436_v2 = vld [vmem:[#allocation7] sm:$0xff]   ;;  %v1437_v4 = vld [vmem:[#allocation7 + $0x8] sm:$0xff]  }
  0x5f   :  { %1225 = vmatprep.subr.bf16.mxu1 %v1410_v22  ;;  %v99_v1 = vpack.c.bf16 %v93_v0, %v87_v63  ;;  %v1438_v5 = vld [vmem:[#allocation7 + $0x10] sm:$0xff]   ;;  %v1439_v6 = vld [vmem:[#allocation7 + $0x18] sm:$0xff]   ;;  %v1440_v7 = vld [vmem:[#allocation7 + $0x20] sm:$0xff]  }
  0x60   :  { %1204 = vmatpush3.bf16.msra.mxu0 %v1409_v21  ;;  %v1441_v8 = vld [vmem:[#allocation7 + $0x28] sm:$0xff]   ;;  %v1442_v9 = vld [vmem:[#allocation7 + $0x30] sm:$0xff]   ;;  %v1443_v10 = vld [vmem:[#allocation7 + $0x38] sm:$0xff]  }
  0x61   :  { %1205 = vmatprep.subr.bf16.mxu0 %v1412_v24  ;;  %v1444_v11 = vld [vmem:[#allocation7 + $0x40] sm:$0xff]   ;;  %v1445_v12 = vld [vmem:[#allocation7 + $0x48] sm:$0xff]   ;;  %v1446_v13 = vld [vmem:[#allocation7 + $0x50] sm:$0xff]  }
  0x62   :  { %1226 = vmatpush3.bf16.msra.mxu1 %v1411_v23  ;;  %v1447_v14 = vld [vmem:[#allocation7 + $0x58] sm:$0xff]   ;;  %v1448_v15 = vld [vmem:[#allocation7 + $0x60] sm:$0xff]   ;;  %v1449_v44 = vld [vmem:[#allocation7 + $0x68] sm:$0xff]  }
  0x63   :  { %1227 = vmatprep.subr.bf16.mxu1 %v1414_v26  ;;  %v1106_v17 = vld [vmem:[%s1772_s2] ss:$0 sm:$0xff]  ;;  %v1457_v0 = vld [vmem:[#allocation7 + $0xa8] sm:$0xff]  }
  0x64   :  { %1206 = vmatpush3.bf16.msra.mxu0 %v1413_v25 }
  0x65   :  { %1207 = vmatprep.subr.bf16.mxu0 %v1416_v28 }
  0x66   :  { %1228 = vmatpush3.bf16.msra.mxu1 %v1415_v27 }
  0x67   :  { %1229 = vmatprep.subr.bf16.mxu1 %v1418_v30 }
  0x68   :  { %1208 = vmatpush3.bf16.msra.mxu0 %v1417_v29 }
  0x69   :  { %1237 = vmatprep.subr.bf16.mxu0 %v1420_v38 }
  0x6a   :  { %1230 = vmatpush3.bf16.msra.mxu1 %v1419_v34 }
  0x6b   :  { %525 = vmatmul.mubr.bf16.vlgmr.msra.gmra.mrb[0].mxu0 %v95_v37  ;;  %1295 = vmatprep.subr.bf16.mxu1 %v1594_v3 }
  0x6c   :  { %1238 = vmatpush3.bf16.msra.mxu0 %v1421_v42  ;;  %606 = vmatprep.mubr.bf16.mxu0 %v100_v59 }
  0x6d   :  { %566 = vmatmul.mubr.bf16.vlgmr.msra.gmra.mrb[0].mxu1 %v97_v45  ;;  %1239 = vmatprep.subr.bf16.mxu0 %v1422_v46  ;;  %v1450_v45 = vld [vmem:[#allocation7 + $0x70] sm:$0xff]   ;;  %v1451_v46 = vld [vmem:[#allocation7 + $0x78] sm:$0xff]  }
  0x6e   :  { %1296 = vmatpush3.bf16.msra.mxu1 %v1436_v2  ;;  %1311 = vmatprep.mubr.msk.bf16.mxu1 %vm1595_vm0, %v1594_v3  ;;  %v1459_v2 = vld [vmem:[#allocation7 + $0xb8] sm:$0xff]  }
  0x6f   :  { %1297 = vmatprep.subr.bf16.mxu1 %v1594_v3 }
  0x70   :  { %1240 = vmatpush3.bf16.msra.mxu0 %v1423_v47  ;;  %v1452_v47 = vld [vmem:[#allocation7 + $0x80] sm:$0xff]  }
  0x71   :  { %1241 = vmatprep.subr.bf16.mxu0 %v1424_v48  ;;  %v1453_v48 = vld [vmem:[#allocation7 + $0x88] sm:$0xff]  }
  0x72   :  { %1298 = vmatpush3.bf16.msra.mxu1 %v1437_v4  ;;  %v1460_v4 = vld [vmem:[#allocation8] sm:$0xff]  }
  0x73   :  { %1299 = vmatprep.subr.bf16.mxu1 %v1594_v3 }
  0x74   :  { %1242 = vmatpush3.bf16.msra.mxu0 %v1425_v49  ;;  %v1454_v49 = vld [vmem:[#allocation7 + $0x90] sm:$0xff]  }
  0x75   :  { %1243 = vmatprep.subr.bf16.mxu0 %v1426_v50  ;;  %v1455_v50 = vld [vmem:[#allocation7 + $0x98] sm:$0xff]  }
  0x76   :  { %1300 = vmatpush3.bf16.msra.mxu1 %v1438_v5  ;;  %v1461_v5 = vld [vmem:[#allocation8 + $0x8] sm:$0xff]  }
  0x77   :  { %1301 = vmatprep.subr.bf16.mxu1 %v1594_v3 }
  0x78   :  { %1244 = vmatpush3.bf16.msra.mxu0 %v1427_v51  ;;  %v1456_v51 = vld [vmem:[#allocation7 + $0xa0] sm:$0xff]  }
  0x79   :  { %1245 = vmatprep.subr.bf16.mxu0 %v1428_v52  ;;  %v1155_v52 = vld [vmem:[%s1774_s4] ss:$0 sm:$0xff] }
  0x7a   :  { %1302 = vmatpush3.bf16.msra.mxu1 %v1439_v6  ;;  %v1462_v6 = vld [vmem:[#allocation8 + $0x10] sm:$0xff]  }
  0x7b   :  { %1303 = vmatprep.subr.bf16.mxu1 %v1594_v3 }
  0x7c   :  { %1246 = vmatpush3.bf16.msra.mxu0 %v1429_v53 }
  0x7d   :  { %1247 = vmatprep.subr.bf16.mxu0 %v1430_v54 }
  0x7e   :  { %1304 = vmatpush3.bf16.msra.mxu1 %v1440_v7  ;;  %v1463_v7 = vld [vmem:[#allocation8 + $0x18] sm:$0xff]  }
  0x7f   :  { %1305 = vmatprep.subr.bf16.mxu1 %v1594_v3 }
  0x80   :  { %1248 = vmatpush3.bf16.msra.mxu0 %v1431_v56 }
  0x81   :  { %1249 = vmatprep.subr.bf16.mxu0 %v1432_v58 }
  0x82   :  { %1306 = vmatpush3.bf16.msra.mxu1 %v1441_v8  ;;  %v1464_v8 = vld [vmem:[#allocation8 + $0x20] sm:$0xff]  }
  0x83   :  { %1307 = vmatprep.subr.bf16.mxu1 %v1594_v3 }
  0x84   :  { %1250 = vmatpush3.bf16.msra.mxu0 %v1433_v60 }
  0x85   :  { %1251 = vmatprep.subr.bf16.mxu0 %v1434_v61 }
  0x86   :  { %1308 = vmatpush3.bf16.msra.mxu1 %v1442_v9  ;;  %v1165_v9 = vld [vmem:[%s1774_s4 + $0x1] ss:$0 sm:$0xff] }
  0x87   :  { %1309 = vmatprep.subr.bf16.mxu1 %v1594_v3 }
  0x88   :  { %1252 = vmatpush3.bf16.msra.mxu0 %v1435_v62 }
  0x89   :  { %1315 = vmatprep.subr.bf16.mxu0 %v1594_v3 }
  0x8a   :  { %1310 = vmatpush3.bf16.msra.mxu1 %v1443_v10 }
  0x8b   :  { %607 = vmatmul.mubr.bf16.vlgmr.msra.gmra.mrb[4].mxu0 %v99_v1  ;;  %1335 = vmatprep.subr.bf16.mxu1 %v1594_v3  ;;  %v1458_v1 = vld [vmem:[#allocation7 + $0xb0] sm:$0xff]  }
  0x8c   :  { %1331 = vmatprep.mubr.msk.bf16.mxu0 %vm1595_vm0, %v1594_v3  ;;  %1316 = vmatpush3.bf16.msra.mxu0 %v1444_v11 }
  0x8d   :  { %1317 = vmatprep.subr.bf16.mxu0 %v1594_v3 }
  0x90   :  { %1318 = vmatpush3.bf16.msra.mxu0 %v1445_v12 }
  0x91   :  { %1319 = vmatprep.subr.bf16.mxu0 %v1594_v3 }
  0x94   :  { %1320 = vmatpush3.bf16.msra.mxu0 %v1446_v13 }
  0x95   :  { %1321 = vmatprep.subr.bf16.mxu0 %v1594_v3 }
  0x98   :  { %1322 = vmatpush3.bf16.msra.mxu0 %v1447_v14 }
  0x99   :  { %1323 = vmatprep.subr.bf16.mxu0 %v1594_v3 }
  0x9c   :  { %1324 = vmatpush3.bf16.msra.mxu0 %v1448_v15 }
  0x9d   :  { %1325 = vmatprep.subr.bf16.mxu0 %v1594_v3 }
  0xa0   :  { %1326 = vmatpush3.bf16.msra.mxu0 %v1449_v44 }
  0xa1   :  { %1327 = vmatprep.subr.bf16.mxu0 %v1594_v3 }
  0xa4   :  { %1328 = vmatpush3.bf16.msra.mxu0 %v1450_v45 }
  0xa5   :  { %1329 = vmatprep.subr.bf16.mxu0 %v1594_v3 }
  0xa8   :  { %1330 = vmatpush3.bf16.msra.mxu0 %v1451_v46 }
  0xa9   :  { %1355 = vmatprep.subr.bf16.mxu0 %v1594_v3 }
 0x13e   :  { %v1209_v16 = vpop.f32.mrb[0].mxu0 }
 0x13f   :  { %v1210_v18 = vpop.f32.mrb[1].mxu0 }
 0x140   :  { %v1211_v19 = vadd.f32 %v1210_v18, %v1209_v16  ;;  %v1212_v20 = vpop.f32.mrb[2].mxu0  ;;  %v1231_v21 = vpop.f32.mrb[0].mxu1 }
 0x141   :  { %v1213_v22 = vpop.f32.mrb[3].mxu0  ;;  %v1232_v25 = vpop.f32.mrb[1].mxu1 }
 0x142   :  { %v527_v23 = vadd.f32 %v1211_v19, %v1106_v17  ;;  %v1214_v24 = vadd.f32 %v1213_v22, %v1212_v20  ;;  %v1233_v26 = vadd.f32 %v1232_v25, %v1231_v21  ;;  %v1234_v27 = vpop.f32.mrb[2].mxu1  ;;  %v1465_v21 = vld [vmem:[#allocation8 + $0x28] sm:$0xff]   ;;  %v1466_v22 = vld [vmem:[#allocation8 + $0x30] sm:$0xff]  }
 0x143   :  { %v1235_v29 = vpop.f32.mrb[3].mxu1 }
 0x144   :  { %v530_v28 = vadd.f32 %v1214_v24, %v1106_v17  ;;  %v568_v30 = vadd.f32 %v1233_v26, %v527_v23  ;;  %v1236_v31 = vadd.f32 %v1235_v29, %v1234_v27  ;;  %v1467_v23 = vld [vmem:[#allocation8 + $0x38] sm:$0xff]   ;;  %v1175_v24 = vld [vmem:[%s1774_s4 + $0x2] ss:$0 sm:$0xff]  ;;  %s1556_s4 = scalar_lea.vmem %s1093_s14, 256 }
 0x145   :  { %p1557_p4 = scmp.ne.s32.totalorder %s1093_s14, %s1556_s4  ;;  %p1562_p6 = scmp.lt.s32.totalorder %s1556_s4, %s1556_s4 }
 0x146   :  { %v571_v32 = vadd.f32 %v1236_v31, %v530_v28 }
 0x147   :  { %p1563_p7 = por %p1562_p6, %p1561_p5 }
 0x149   :  { %p1564_p8 = pnand %p1563_p7, %p1557_p4 }
 0x15e   :  { %v1253_v33 = vpop.f32.mrb[4].mxu0 }
 0x15f   :  { %v1254_v34 = vpop.f32.mrb[5].mxu0 }
 0x160   :  { %v1255_v35 = vadd.f32 %v1254_v34, %v1253_v33  ;;  %v1256_v36 = vpop.f32.mrb[6].mxu0 }
 0x161   :  { %v1257_v37 = vpop.f32.mrb[7].mxu0 }
 0x162   :  { %v609_v38 = vadd.f32 %v1255_v35, %v568_v30  ;;  %v1258_v39 = vadd.f32 %v1257_v37, %v1256_v36 }
 0x164   :  { %v612_v40 = vadd.f32 %v1258_v39, %v571_v32  ;;  %v615_v41 = vmax.f32 %v609_v38, 0.0 }
 0x166   :  { %v616_v42 = vmax.f32 %v612_v40, 0.0 }
 0x168   :  { %v617_v43 = vpack.c.bf16 %v616_v42, %v615_v41 }
 0x16a   :  { %1312 = vmatmul.mubr.bf16.vlgmr.msra.gmra.mrb[4].mxu1 %v617_v43 }
 0x16b   :  { %1351 = vmatprep.mubr.msk.bf16.mxu1 %vm1595_vm0, %v1594_v3  ;;  %1336 = vmatpush3.bf16.msra.mxu1 %v1452_v47 }
 0x16c   :  { %1337 = vmatprep.subr.bf16.mxu1 %v1594_v3 }
 0x16f   :  { %1338 = vmatpush3.bf16.msra.mxu1 %v1453_v48 }
 0x170   :  { %1339 = vmatprep.subr.bf16.mxu1 %v1594_v3 }
 0x173   :  { %1340 = vmatpush3.bf16.msra.mxu1 %v1454_v49 }
 0x174   :  { %1341 = vmatprep.subr.bf16.mxu1 %v1594_v3 }
 0x177   :  { %1342 = vmatpush3.bf16.msra.mxu1 %v1455_v50 }
 0x178   :  { %1343 = vmatprep.subr.bf16.mxu1 %v1594_v3 }
 0x17b   :  { %1344 = vmatpush3.bf16.msra.mxu1 %v1456_v51 }
 0x17c   :  { %1345 = vmatprep.subr.bf16.mxu1 %v1594_v3 }
 0x17f   :  { %1346 = vmatpush3.bf16.msra.mxu1 %v1457_v0 }
 0x180   :  { %1347 = vmatprep.subr.bf16.mxu1 %v1594_v3 }
 0x183   :  { %1348 = vmatpush3.bf16.msra.mxu1 %v1458_v1 }
 0x184   :  { %1349 = vmatprep.subr.bf16.mxu1 %v1594_v3 }
 0x187   :  { %1350 = vmatpush3.bf16.msra.mxu1 %v1459_v2 }
 0x23d   :  { %v723_v53 = vpop.f32.mrb[4].mxu1 }
 0x23e   :  { %v724_v54 = vadd.f32 %v1155_v52, %v723_v53  ;;  %v1313_v55 = vpop.f32.mrb[5].mxu1 }
 0x23f   :  { %v726_v56 = vpop.f32.mrb[6].mxu1 }
 0x240   :  { %v730_v57 = vmax.f32 %v724_v54, 0.0  ;;  %v727_v58 = vadd.f32 %v1155_v52, %v726_v56  ;;  %v1314_v59 = vpop.f32.mrb[7].mxu1 }
 0x242   :  { %v731_v60 = vmax.f32 %v727_v58, 0.0  ;;  %v732_v61 = vadd.f32 %v730_v57, %v615_v41 }
 0x244   :  { %v733_v62 = vadd.f32 %v731_v60, %v616_v42 }
 0x246   :  { %v734_v63 = vpack.c.bf16 %v733_v62, %v732_v61 }
 0x248   :  { %1332 = vmatmul.mubr.bf16.vlgmr.msra.gmra.mrb[8].mxu0 %v734_v63 }
 0x249   :  { %1371 = vmatprep.mubr.msk.bf16.mxu0 %vm1595_vm0, %v1594_v3  ;;  %1356 = vmatpush3.bf16.msra.mxu0 %v1460_v4 }
 0x24a   :  { %1357 = vmatprep.subr.bf16.mxu0 %v1594_v3 }
 0x24d   :  { %1358 = vmatpush3.bf16.msra.mxu0 %v1461_v5 }
 0x24e   :  { %1359 = vmatprep.subr.bf16.mxu0 %v1594_v3 }
 0x251   :  { %1360 = vmatpush3.bf16.msra.mxu0 %v1462_v6 }
 0x252   :  { %1361 = vmatprep.subr.bf16.mxu0 %v1594_v3 }
 0x255   :  { %1362 = vmatpush3.bf16.msra.mxu0 %v1463_v7 }
 0x256   :  { %1363 = vmatprep.subr.bf16.mxu0 %v1594_v3 }
 0x259   :  { %1364 = vmatpush3.bf16.msra.mxu0 %v1464_v8 }
 0x25a   :  { %1365 = vmatprep.subr.bf16.mxu0 %v1594_v3 }
 0x25d   :  { %1366 = vmatpush3.bf16.msra.mxu0 %v1465_v21 }
 0x25e   :  { %1367 = vmatprep.subr.bf16.mxu0 %v1594_v3 }
 0x261   :  { %1368 = vmatpush3.bf16.msra.mxu0 %v1466_v22 }
 0x262   :  { %1369 = vmatprep.subr.bf16.mxu0 %v1594_v3  ;;  %v1184_v3 = vld [vmem:[%s1776_s6] ss:$0 sm:$0xff] }
 0x265   :  { %1370 = vmatpush3.bf16.msra.mxu0 %v1467_v23 }
 0x31b   :  { %v842_v10 = vpop.f32.mrb[8].mxu0 }
 0x31c   :  { %v843_v11 = vadd.f32 %v1165_v9, %v842_v10  ;;  %v1333_v12 = vpop.f32.mrb[9].mxu0 }
 0x31d   :  { %v845_v13 = vpop.f32.mrb[10].mxu0 }
 0x31e   :  { %v849_v14 = vmax.f32 %v843_v11, 0.0  ;;  %v846_v15 = vadd.f32 %v1165_v9, %v845_v13  ;;  %v1334_v16 = vpop.f32.mrb[11].mxu0 }
 0x320   :  { %v850_v17 = vmax.f32 %v846_v15, 0.0  ;;  %v851_v18 = vadd.f32 %v849_v14, %v732_v61 }
 0x322   :  { %v852_v19 = vadd.f32 %v850_v17, %v733_v62 }
 0x324   :  { %v853_v20 = vpack.c.bf16 %v852_v19, %v851_v18 }
 0x326   :  { %1352 = vmatmul.mubr.bf16.vlgmr.msra.gmra.mrb[8].mxu1 %v853_v20 }
 0x3f9   :  { %v961_v25 = vpop.f32.mrb[8].mxu1 }
 0x3fa   :  { %v962_v26 = vadd.f32 %v1175_v24, %v961_v25  ;;  %v1353_v27 = vpop.f32.mrb[9].mxu1 }
 0x3fb   :  { %v964_v28 = vpop.f32.mrb[10].mxu1 }
 0x3fc   :  { %v968_v29 = vmax.f32 %v962_v26, 0.0  ;;  %v965_v30 = vadd.f32 %v1175_v24, %v964_v28  ;;  %v1354_v31 = vpop.f32.mrb[11].mxu1 }
 0x3fe   :  { %v969_v32 = vmax.f32 %v965_v30, 0.0  ;;  %v970_v33 = vadd.f32 %v968_v29, %v851_v18 }
 0x400   :  { %v971_v34 = vadd.f32 %v969_v32, %v852_v19 }
 0x402   :  { %v972_v35 = vpack.c.bf16 %v971_v34, %v970_v33 }
 0x404   :  { %1372 = vmatmul.mubr.bf16.vlgmr.msra.gmra.mrb[12].mxu0 %v972_v35 }
 0x4d7   :  { %v1078_v36 = vpop.f32.mrb[12].mxu0 }
 0x4d8   :  { %v1079_v37 = vadd.f32 %v1184_v3, %v1078_v36  ;;  %v1373_v38 = vpop.f32.mrb[13].mxu0 }
 0x4d9   :  { %v1081_v39 = vpop.f32.mrb[14].mxu0 }
 0x4da   :  { %1085 = vst [vmem:[#allocation10] sm:$0xff] %v1079_v37  ;;  %v1082_v40 = vadd.f32 %v1184_v3, %v1081_v39  ;;  %v1374_v41 = vpop.f32.mrb[15].mxu0 }
 0x4dc   :  { %1086 = vst [vmem:[#allocation10 + $0x8] sm:$0xff] %v1082_v40 }
 0x4dd   :  { %1567 = shalt.err (!%p1564_p8)
}
 0x4de   :  { %s1568_s17 = scalar_lea.hbm %s1777_s7, 256 }
 0x4df   :  { %p1569_p9 = scmp.ne.s32.totalorder %s1777_s7, %s1568_s17  ;;  %p1572_p10 = scmp.lt.u32.totalorder %s1568_s17, %s1777_s7 }
 0x4e1   :  { %p1574_p11 = pnand %p1572_p10, %p1569_p9 }
 0x4e3   :  { %1577 = shalt.err (!%p1574_p11)
}
 0x4e4   :  { %s1597_s20 = smov 128   ;;  %s1598_s21 = smov 8  }
 0x4e5   :  { %1098 = dma.vmem_to_hbm [thread:$0]  %s1093_s14, 256, %s1777_s7, [#allocation4], %s1597_s20, %s1597_s20, %s1598_s21  }
 0x4e6   :  { %1584 = dma.done.wait [#allocation4], 256  }
 0x4e7   :  { %1585 = vsyncadd [#allocation4], 4294967040 }
 0x4e8   :  { %1102 = vsyncpa [#allocation3], 1 }
 0x4e9   :  { %1103 = vsyncpa [#allocation6], 1 }
 0x4ea   :  { %1104 = vsyncpa [#allocation9], 1 }
 0x4eb   :  { %1105 = vsyncpa [#allocation4], 1 }

</bundles_post_ra>
